<compile_context>
chip_gen: v7x
topology: tpu7x:2x2x1
jax: 0.10.0
libtpu: 0.0.40
codegen_flags: <defaults>
</compile_context>

<pallas_src>
import functools

import jax
import jax.numpy as jnp
from jax.experimental import pallas as pl
from jax.experimental.pallas import tpu as pltpu


def _ce_loss_kernel(ig_ref, x_ref, t_ref, out_ref, *, num_classes, num_ignore, total_p):
    b = pl.program_id(0)
    p_idx = pl.program_id(1)

    @pl.when(p_idx == 0)
    def _init():
        out_ref[...] = jnp.zeros_like(out_ref)

    logits = x_ref[0].astype(jnp.float32)      # (C, TILE_P)  P lane-dense, widen in-register
    tgt = t_ref[0]                             # (1, TILE_P)  int32
    tile_p = logits.shape[1]

    # max over classes: short unrolled loop over the C sublane rows (C is small)
    m = logits[0:1, :]
    for c in range(1, num_classes):
        m = jnp.maximum(m, logits[c:c + 1, :])

    # single unrolled pass: softmax denominator + shifted logit of the target class
    # (avoids materializing a (P, C) one-hot / iota temporary)
    denom = jnp.zeros((1, tile_p), jnp.float32)
    tgt_shifted = jnp.zeros((1, tile_p), jnp.float32)
    for c in range(num_classes):
        sh = logits[c:c + 1, :] - m
        denom = denom + jnp.exp(sh)
        tgt_shifted = tgt_shifted + jnp.where(tgt == c, sh, 0.0)

    loss = jnp.log(denom) - tgt_shifted        # (1, TILE_P) = lse - logit[target]

    # valid mask: in-bounds (spatial padding) and not an ignored class for batch b
    col = jax.lax.broadcasted_iota(jnp.int32, (1, tile_p), 1) + p_idx * tile_p
    valid = col < total_p
    for k in range(num_ignore):
        valid = jnp.logical_and(valid, tgt != ig_ref[b, k])
    validf = valid.astype(jnp.float32)

    tile_sum = jnp.sum(loss * validf)
    tile_cnt = jnp.sum(validf)

    # accumulate (sum, count) into the per-batch resident output block
    lane = jax.lax.broadcasted_iota(jnp.int32, (1, 1, 2), 2)
    out_ref[...] += jnp.where(lane == 0, tile_sum, tile_cnt)


def _choose_tile_p(P, C, itemsize):
    # Target ~4 MiB per pipeline step (logits tile + int32 target tile); with
    # 2-deep buffering that is ~8 MiB of VMEM, comfortably under the 32 MiB
    # scoped default on every generation (v7x has only 64 MiB physical VMEM,
    # v5e/v6e have 128 MiB so this also amortizes the ~0.35 us per-step cost).
    step_budget = 4 * 1024 * 1024
    bytes_per_col = C * itemsize + 4
    tile = step_budget // bytes_per_col
    tile = max(128, (tile // 128) * 128)
    p_up = ((P + 127) // 128) * 128
    return int(min(tile, p_up))


def custom_batch_cross_entropy_loss(logits_nchw, target_nhw, ignore_classes_nk, *, tile_p=None):
    """logits_nchw: (N,C,H,W); target_nhw: (N,H,W) int; ignore_classes_nk: (N,K) int (pad with -1)."""
    N, C, H, W = logits_nchw.shape
    P = H * W
    if tile_p is None:
        tile_p = _choose_tile_p(P, C, jnp.dtype(logits_nchw.dtype).itemsize)

    # Free reshapes: stay in NCHW layout and native dtype (no extra HBM passes).
    x = logits_nchw.reshape(N, C, P)
    t = target_nhw.reshape(N, 1, P).astype(jnp.int32)
    ig = ignore_classes_nk.astype(jnp.int32)
    K = ig.shape[1]

    p_pad = ((P + tile_p - 1) // tile_p) * tile_p
    if p_pad != P:
        x = jnp.pad(x, ((0, 0), (0, 0), (0, p_pad - P)))
        t = jnp.pad(t, ((0, 0), (0, 0), (0, p_pad - P)))
    num_tiles = p_pad // tile_p

    kernel = functools.partial(_ce_loss_kernel, num_classes=C, num_ignore=K, total_p=P)
    out = pl.pallas_call(
        kernel,
        out_shape=jax.ShapeDtypeStruct((N, 1, 2), jnp.float32),
        grid_spec=pltpu.PrefetchScalarGridSpec(
            num_scalar_prefetch=1,
            grid=(N, num_tiles),
            in_specs=[
                pl.BlockSpec((1, C, tile_p), lambda b, p, ig_ref: (b, 0, p)),
                pl.BlockSpec((1, 1, tile_p), lambda b, p, ig_ref: (b, 0, p)),
            ],
            out_specs=pl.BlockSpec((1, 1, 2), lambda b, p, ig_ref: (b, 0, 0)),
        ),
        compiler_params=pltpu.CompilerParams(
            dimension_semantics=("parallel", "arbitrary")),
    )(ig, x, t)

    # Per-batch masked mean, then mean over batches (matches the PyTorch module).
    # NOTE: if every pixel of a batch is ignored, count == 0 -> NaN, identical to
    # torch.tensor([]).mean() in the reference module semantics.
    per_batch = out[:, 0, 0] / out[:, 0, 1]
    return jnp.sum(per_batch) / jnp.float32(N)


def _reference(logits_nchw, target_nhw, ignore_classes_nk):
    x = logits_nchw.astype(jnp.float32)
    logp = jax.nn.log_softmax(x, axis=1)                               # (N,C,H,W)
    ll = jnp.take_along_axis(logp, target_nhw[:, None].astype(jnp.int32), axis=1)[:, 0]
    loss = -ll                                                         # (N,H,W)
    N = x.shape[0]
    total = jnp.float32(0.0)
    for b in range(N):
        tgt_flat = target_nhw[b].reshape(-1)
        valid = jnp.ones_like(tgt_flat, dtype=bool)
        for k in range(ignore_classes_nk.shape[1]):
            valid = valid & (tgt_flat != ignore_classes_nk[b, k])
        lb = loss[b].reshape(-1)
        total = total + jnp.sum(lb * valid.astype(jnp.float32)) / jnp.sum(valid.astype(jnp.float32))
    return total / N


if __name__ == "__main__":
    key = jax.random.PRNGKey(0)
    k1, k2, k3, k4 = jax.random.split(key, 4)

    # Case 1: P = 256 -> two 128-wide spatial tiles per batch (exercises accumulation)
    N, C, H, W = 2, 4, 16, 16
    logits = jax.random.normal(k1, (N, C, H, W), dtype=jnp.float32)
    target = jax.random.randint(k2, (N, H, W), 0, C, dtype=jnp.int32)
    ignore = jnp.array([[0, -1], [1, 2]], dtype=jnp.int32)  # -1 pads "ignore nothing else"
    out = jax.block_until_ready(custom_batch_cross_entropy_loss(logits, target, ignore, tile_p=128))
    ref = jax.block_until_ready(_reference(logits, target, ignore))
    assert jnp.allclose(out, ref, rtol=1e-5, atol=1e-5), (out, ref)

    # Case 2: P = 100 -> padded to 128 (exercises the in-bounds mask path)
    N2, C2, H2, W2 = 2, 5, 10, 10
    logits2 = jax.random.normal(k3, (N2, C2, H2, W2), dtype=jnp.float32)
    target2 = jax.random.randint(k4, (N2, H2, W2), 0, C2, dtype=jnp.int32)
    ignore2 = jnp.array([[3], [0]], dtype=jnp.int32)
    out2 = jax.block_until_ready(custom_batch_cross_entropy_loss(logits2, target2, ignore2))
    ref2 = jax.block_until_ready(_reference(logits2, target2, ignore2))
    assert jnp.allclose(out2, ref2, rtol=1e-5, atol=1e-5), (out2, ref2)

    print("KERNEL_OK")
</pallas_src>

<mosaic_0001>
module attributes {stable_mosaic.version = 11 : i64} {
  func.func @_ce_loss_kernel(%arg0: i32, %arg1: i32, %arg2: memref<2x2xi32, #tpu.memory_space<smem>>, %arg3: memref<1x4x128xf32, #tpu.memory_space<vmem>>, %arg4: memref<1x1x128xi32, #tpu.memory_space<vmem>>, %arg5: memref<1x1x2xf32, #tpu.memory_space<vmem>>) attributes {dimension_semantics = [#tpu.dimension_semantics<parallel>, #tpu.dimension_semantics<arbitrary>], iteration_bounds = array<i64: 2, 2>, scalar_prefetch = 1 : i64, scratch_operands = 0 : i64, tpu.core_type = #tpu.core_type<tc>, window_params = [{transform_indices = @transform_0, window_bounds = array<i64: 1, 4, 128>}, {transform_indices = @transform_1, window_bounds = array<i64: 1, 1, 128>}, {transform_indices = @transform_2, window_bounds = array<i64: 1, 1, 2>}]} {
    %c0_i32 = arith.constant 0 : i32
    %0 = arith.cmpi eq, %arg1, %c0_i32 : i32
    %1 = arith.extui %0 : i1 to i32
    %c0_i32_0 = arith.constant 0 : i32
    %2 = arith.cmpi ne, %1, %c0_i32_0 : i32
    scf.if %2 {
      %cst_22 = arith.constant 0.000000e+00 : f32
      %90 = vector.broadcast %cst_22 : f32 to vector<1x1x2xf32>
      %c0_23 = arith.constant 0 : index
      %c0_24 = arith.constant 0 : index
      %c0_25 = arith.constant 0 : index
      %91 = vector.load %arg5[%c0_23, %c0_24, %c0_25] : memref<1x1x2xf32, #tpu.memory_space<vmem>>, vector<1x1x2xf32>
      tpu.vector_store %arg5[%c0_23, %c0_24, %c0_25], %90 {strides = array<i32>} : memref<1x1x2xf32, #tpu.memory_space<vmem>>, vector<1x1x2xf32>,
    } else {
    }
    %c0 = arith.constant 0 : index
    %c0_1 = arith.constant 0 : index
    %c0_2 = arith.constant 0 : index
    %3 = vector.load %arg3[%c0, %c0_1, %c0_2] : memref<1x4x128xf32, #tpu.memory_space<vmem>>, vector<1x4x128xf32>
    %4 = vector.shape_cast %3 : vector<1x4x128xf32> to vector<4x128xf32>
    %c0_3 = arith.constant 0 : index
    %c0_4 = arith.constant 0 : index
    %c0_5 = arith.constant 0 : index
    %5 = vector.load %arg4[%c0_3, %c0_4, %c0_5] : memref<1x1x128xi32, #tpu.memory_space<vmem>>, vector<1x1x128xi32>
    %6 = vector.shape_cast %5 : vector<1x1x128xi32> to vector<1x128xi32>
    %7 = vector.extract_strided_slice %4 {offsets = [0, 0], sizes = [1, 128], strides = [1, 1]} : vector<4x128xf32> to vector<1x128xf32>
    %8 = vector.extract_strided_slice %4 {offsets = [1, 0], sizes = [1, 128], strides = [1, 1]} : vector<4x128xf32> to vector<1x128xf32>
    %9 = arith.maximumf %7, %8 : vector<1x128xf32>
    %10 = vector.extract_strided_slice %4 {offsets = [2, 0], sizes = [1, 128], strides = [1, 1]} : vector<4x128xf32> to vector<1x128xf32>
    %11 = arith.maximumf %9, %10 : vector<1x128xf32>
    %12 = vector.extract_strided_slice %4 {offsets = [3, 0], sizes = [1, 128], strides = [1, 1]} : vector<4x128xf32> to vector<1x128xf32>
    %13 = arith.maximumf %11, %12 : vector<1x128xf32>
    %cst = arith.constant 0.000000e+00 : f32
    %14 = vector.broadcast %cst : f32 to vector<1x128xf32>
    %cst_6 = arith.constant 0.000000e+00 : f32
    %15 = vector.broadcast %cst_6 : f32 to vector<1x128xf32>
    %16 = vector.extract_strided_slice %4 {offsets = [0, 0], sizes = [1, 128], strides = [1, 1]} : vector<4x128xf32> to vector<1x128xf32>
    %17 = arith.subf %16, %13 : vector<1x128xf32>
    %18 = math.exp %17 : vector<1x128xf32>
    %19 = arith.addf %14, %18 : vector<1x128xf32>
    %c0_i32_7 = arith.constant 0 : i32
    %20 = vector.broadcast %c0_i32_7 : i32 to vector<1x128xi32>
    %21 = arith.cmpi eq, %6, %20 : vector<1x128xi32>
    %cst_8 = arith.constant 0.000000e+00 : f32
    %22 = vector.broadcast %cst_8 : f32 to vector<1x128xf32>
    %23 = arith.select %21, %17, %22 : vector<1x128xi1>, vector<1x128xf32>
    %24 = arith.addf %15, %23 : vector<1x128xf32>
    %25 = vector.extract_strided_slice %4 {offsets = [1, 0], sizes = [1, 128], strides = [1, 1]} : vector<4x128xf32> to vector<1x128xf32>
    %26 = arith.subf %25, %13 : vector<1x128xf32>
    %27 = math.exp %26 : vector<1x128xf32>
    %28 = arith.addf %19, %27 : vector<1x128xf32>
    %c1_i32 = arith.constant 1 : i32
    %29 = vector.broadcast %c1_i32 : i32 to vector<1x128xi32>
    %30 = arith.cmpi eq, %6, %29 : vector<1x128xi32>
    %cst_9 = arith.constant 0.000000e+00 : f32
    %31 = vector.broadcast %cst_9 : f32 to vector<1x128xf32>
    %32 = arith.select %30, %26, %31 : vector<1x128xi1>, vector<1x128xf32>
    %33 = arith.addf %24, %32 : vector<1x128xf32>
    %34 = vector.extract_strided_slice %4 {offsets = [2, 0], sizes = [1, 128], strides = [1, 1]} : vector<4x128xf32> to vector<1x128xf32>
    %35 = arith.subf %34, %13 : vector<1x128xf32>
    %36 = math.exp %35 : vector<1x128xf32>
    %37 = arith.addf %28, %36 : vector<1x128xf32>
    %c2_i32 = arith.constant 2 : i32
    %38 = vector.broadcast %c2_i32 : i32 to vector<1x128xi32>
    %39 = arith.cmpi eq, %6, %38 : vector<1x128xi32>
    %cst_10 = arith.constant 0.000000e+00 : f32
    %40 = vector.broadcast %cst_10 : f32 to vector<1x128xf32>
    %41 = arith.select %39, %35, %40 : vector<1x128xi1>, vector<1x128xf32>
    %42 = arith.addf %33, %41 : vector<1x128xf32>
    %43 = vector.extract_strided_slice %4 {offsets = [3, 0], sizes = [1, 128], strides = [1, 1]} : vector<4x128xf32> to vector<1x128xf32>
    %44 = arith.subf %43, %13 : vector<1x128xf32>
    %45 = math.exp %44 : vector<1x128xf32>
    %46 = arith.addf %37, %45 : vector<1x128xf32>
    %c3_i32 = arith.constant 3 : i32
    %47 = vector.broadcast %c3_i32 : i32 to vector<1x128xi32>
    %48 = arith.cmpi eq, %6, %47 : vector<1x128xi32>
    %cst_11 = arith.constant 0.000000e+00 : f32
    %49 = vector.broadcast %cst_11 : f32 to vector<1x128xf32>
    %50 = arith.select %48, %44, %49 : vector<1x128xi1>, vector<1x128xf32>
    %51 = arith.addf %42, %50 : vector<1x128xf32>
    %52 = math.log %46 : vector<1x128xf32>
    %53 = arith.subf %52, %51 : vector<1x128xf32>
    %54 = tpu.iota {dimensions = array<i32: 1>} : vector<1x128xi32>
    %c128_i32 = arith.constant 128 : i32
    %55 = arith.muli %arg1, %c128_i32 : i32
    %56 = vector.broadcast %55 : i32 to vector<1x128xi32>
    %57 = arith.addi %54, %56 : vector<1x128xi32>
    %c256_i32 = arith.constant 256 : i32
    %58 = vector.broadcast %c256_i32 : i32 to vector<1x128xi32>
    %59 = arith.cmpi slt, %57, %58 : vector<1x128xi32>
    %60 = arith.index_cast %arg0 : i32 to index
    %c0_12 = arith.constant 0 : index
    %61 = memref.load %arg2[%60, %c0_12] : memref<2x2xi32, #tpu.memory_space<smem>>
    %62 = vector.broadcast %61 : i32 to vector<1x128xi32>
    %63 = arith.cmpi ne, %6, %62 : vector<1x128xi32>
    %64 = arith.andi %59, %63 : vector<1x128xi1>
    %65 = arith.index_cast %arg0 : i32 to index
    %c1 = arith.constant 1 : index
    %66 = memref.load %arg2[%65, %c1] : memref<2x2xi32, #tpu.memory_space<smem>>
    %67 = vector.broadcast %66 : i32 to vector<1x128xi32>
    %68 = arith.cmpi ne, %6, %67 : vector<1x128xi32>
    %69 = arith.andi %64, %68 : vector<1x128xi1>
    %70 = arith.extui %69 : vector<1x128xi1> to vector<1x128xi32>
    %71 = arith.sitofp %70 : vector<1x128xi32> to vector<1x128xf32>
    %72 = arith.mulf %53, %71 : vector<1x128xf32>
    %73 = vector.shape_cast %72 : vector<1x128xf32> to vector<1x1x128xf32>
    %cst_13 = arith.constant dense<0.000000e+00> : vector<1xf32>
    %74 = vector.multi_reduction <add>, %73, %cst_13 [1, 2] : vector<1x1x128xf32> to vector<1xf32>
    %75 = vector.shape_cast %74 : vector<1xf32> to vector<1x1x1xf32>
    %76 = vector.extract %75[0, 0, 0] : f32 from vector<1x1x1xf32>
    %77 = vector.shape_cast %71 : vector<1x128xf32> to vector<1x1x128xf32>
    %cst_14 = arith.constant dense<0.000000e+00> : vector<1xf32>
    %78 = vector.multi_reduction <add>, %77, %cst_14 [1, 2] : vector<1x1x128xf32> to vector<1xf32>
    %79 = vector.shape_cast %78 : vector<1xf32> to vector<1x1x1xf32>
    %80 = vector.extract %79[0, 0, 0] : f32 from vector<1x1x1xf32>
    %81 = tpu.iota {dimensions = array<i32: 2>} : vector<1x1x2xi32>
    %c0_15 = arith.constant 0 : index
    %c0_16 = arith.constant 0 : index
    %c0_17 = arith.constant 0 : index
    %82 = vector.load %arg5[%c0_15, %c0_16, %c0_17] : memref<1x1x2xf32, #tpu.memory_space<vmem>>, vector<1x1x2xf32>
    %c0_i32_18 = arith.constant 0 : i32
    %83 = vector.broadcast %c0_i32_18 : i32 to vector<1x1x2xi32>
    %84 = arith.cmpi eq, %81, %83 : vector<1x1x2xi32>
    %85 = vector.broadcast %76 : f32 to vector<1x1x2xf32>
    %86 = vector.broadcast %80 : f32 to vector<1x1x2xf32>
    %87 = arith.select %84, %85, %86 : vector<1x1x2xi1>, vector<1x1x2xf32>
    %88 = arith.addf %82, %87 : vector<1x1x2xf32>
    %c0_19 = arith.constant 0 : index
    %c0_20 = arith.constant 0 : index
    %c0_21 = arith.constant 0 : index
    %89 = vector.load %arg5[%c0_19, %c0_20, %c0_21] : memref<1x1x2xf32, #tpu.memory_space<vmem>>, vector<1x1x2xf32>
    tpu.vector_store %arg5[%c0_19, %c0_20, %c0_21], %88 {strides = array<i32>} : memref<1x1x2xf32, #tpu.memory_space<vmem>>, vector<1x1x2xf32>,
    return
  }
  func.func @transform_0(%arg0: i32, %arg1: i32, %arg2: memref<2x2xi32, #tpu.memory_space<smem>>) -> (i32, i32, i32) {
    %c0_i32 = arith.constant 0 : i32
    %c0_i32_0 = arith.constant 0 : i32
    return %arg0, %c0_i32, %arg1 : i32, i32, i32
  }
  func.func @transform_1(%arg0: i32, %arg1: i32, %arg2: memref<2x2xi32, #tpu.memory_space<smem>>) -> (i32, i32, i32) {
    %c0_i32 = arith.constant 0 : i32
    %c0_i32_0 = arith.constant 0 : i32
    return %arg0, %c0_i32, %arg1 : i32, i32, i32
  }
  func.func @transform_2(%arg0: i32, %arg1: i32, %arg2: memref<2x2xi32, #tpu.memory_space<smem>>) -> (i32, i32, i32) {
    %c0_i32 = arith.constant 0 : i32
    %c0_i32_0 = arith.constant 0 : i32
    %c0_i32_1 = arith.constant 0 : i32
    return %arg0, %c0_i32, %c0_i32_0 : i32, i32, i32
  }
}

</mosaic_0001>

<bundles_post_ra>
// kernel: tpu_custom_call.1
= control target key start
LH: loop header
LB: loop body
LE: loop exit
PB: predicated region body
PF: predicated region fallthrough
CT: control target
= control target key end

     0   :  { %s1070_s0 = inlined_call_operand.hbm [shape: s32[2,2], index: 0, kind: input, shape index: {}]   ;;  %s1071_s1 = inlined_call_operand.hbm [shape: f32[2,4,256], index: 1, kind: input, shape index: {}]   ;;  %s1072_s2 = inlined_call_operand.vmem [shape: s32[2,1,256], index: 2, kind: input, shape index: {}]   ;;  %s1073_s3 = inlined_call_operand.hbm [shape: f32[2,1,2], index: 3, kind: output, shape index: {}]  }
   0x1   :  { %s616_s14 = scalar_lea.hbm %s1070_s0, 32 }
   0x2   :  { %p617_p0 = scmp.ne.s32.totalorder %s1070_s0, %s616_s14  ;;  %p620_p1 = scmp.lt.u32.totalorder %s616_s14, %s1070_s0 }
   0x4   :  { %p622_p2 = pnand %p620_p1, %p617_p0 }
   0x6   :  { %625 = shalt.err (!%p622_p2)  }
   0x7   :  { %s782_s19 = smov [#allocation3]  }
   0x8   :  { %9 = dma.hbm_to_smem %s1070_s0, 32, %s782_s19, [#allocation2] }
   0x9   :  { %728 = dma.done.wait [#allocation2], 32 }
   0xa   :  { %729 = vsyncadd [#allocation2], 4294967264 }
   0xb   :  { %11 = sfence }
   0xc   :  { %12 = vsyncpa [#allocation5], 0 }
   0xd   :  { %14 = vsyncpa [#allocation5 + $0x1], 0 }
   0xe   :  { %15 = vsyncpa [#allocation6], 0 }
   0xf   :  { %17 = vsyncpa [#allocation6 + $0x1], 0  ;;  %s820_s22 = smov 0   ;;  %s822_s23 = smov 0  }
  0x10   :  { %s824_s24 = smov 0   ;;  %s826_s25 = smov 0  }
  0x11   :  { %s828_s26 = smov 0   ;;  %s830_s27 = smov 0  }
  0x12   :  { %s832_s0 = smov 0   ;;  %s834_s28 = smov 0  }
  0x13   :  { %s836_s29 = smov 0   ;;  %s838_s30 = smov 0  }
  0x14   :  { %s840_s4 = smov 0  }
  0x15 LB: > { %s479_s5 = sadd.s32 4294967295, %s780_s4   ;;  %s480_s6 = sadd.s32 4294967294, %s780_s4   ;;  %s780_s4 = sphi %s840_s4, %s23_s4   ;;  %s776_s30 = sphi %s838_s30, %s1096_s30   ;;  %s772_s29 = sphi %s836_s29, %s1095_s29   ;;  %s768_s28 = sphi %s834_s28, %s1094_s28   ;;  %s764_s0 = sphi %s832_s0, %s1093_s0   ;;  %s760_s27 = sphi %s830_s27, %s1092_s27   ;;  %s756_s26 = sphi %s828_s26, %s1091_s26   ;;  %s752_s25 = sphi %s826_s25, %s1090_s25   ;;  %s748_s24 = sphi %s824_s24, %s1089_s24   ;;  %s744_s23 = sphi %s822_s23, %s1088_s23   ;;  %s740_s22 = sphi %s820_s22, %s1087_s22  }
  0x16   : > { %s32_s7 = sadd.s32 1, %s772_s29  ;;  %s35_s8 = sadd.s32 1, %s776_s30 }
  0x17   : > { %p33_p3 = scmp.ge.s32.totalorder %s32_s7, 2  ;;  %s44_s9 = sadd.s32 1, %s760_s27 }
  0x18   : > { %p51_p4 = scmp.ne.s32.totalorder %s760_s27, %s756_s26  ;;  %p52_p5 = scmp.eq.s32.totalorder %s780_s4, 0 }
  0x19   : > { %s1098_s7 = smov (%p33_p3, %s32_s7), 0  ;;  %s1100_s8 = smov (!%p33_p3, %s35_s8), %s776_s30 }
  0x1a   : > { %s40_s10 = ssub.s32 %s772_s29, %s1098_s7  ;;  %p886_p6 = por %p52_p5, %p51_p4 }
  0x1b   : > { %p37_p7 = scmp.ge.s32.totalorder %s1100_s8, 2  ;;  %p57_p8 = scmp.ne.s32.totalorder %s756_s26, %s752_s25 }
  0x1c   : > { %p58_p9 = scmp.eq.s32.totalorder %s479_s5, 0  ;;  %s98_s12 = sadd.s32 1, %s748_s24 }
  0x1d   : > { %s1102_s8 = smov (%p37_p7, %s1100_s8), 0  ;;  %p108_p11 = scmp.ne.s32.totalorder %s748_s24, %s744_s23 }
  0x1e   : > { %1077 = sst [smem:[#allocation11_spill]] %s1102_s8  ;;  %p894_p10 = por %p58_p9, %p57_p8 }
  0x1f   : > { %s39_s14 = ssub.s32 %s776_s30, %s1102_s8  ;;  %p109_p12 = scmp.eq.s32.totalorder %s479_s5, 3 }
  0x20   : > { %s41_s15 = sor.u32 %s40_s10, %s39_s14  ;;  %p96_p13 = scmp.eq.s32.totalorder %s39_s14, 0 }
  0x21   : > { %p42_p0 = scmp.eq.s32.totalorder %s41_s15, 0  ;;  %p902_p1 = por %p109_p12, %p108_p11 }
  0x22   : > { %s907_s17 = scalar_select %p96_p13, %s748_s24, %s98_s12  }
  0x23   : > { %s1079_s16 = scalar_select %p902_p1, 1, 0 }
  0x24   : > { %s910_s18 = scalar_select %p42_p0, %s760_s27, %s44_s9  }
  0x25   : > { %p114_p2 = scmp.ne.s32.totalorder %s744_s23, %s740_s22  ;;  %p115_p3 = scmp.eq.s32.totalorder %s480_s6, 3 }
  0x26   : > { %p512_p4 = scmp.lt.s32.totalorder %s780_s4, 4  ;;  %s135_s20 = sand.u32 1, %s760_s27  }
  0x27   : > { %p915_p5 = por %p115_p3, %p114_p2  ;;  %s483_s21 = sshll.u32 %s135_s20, 2 }
  0x28   : > { %s484_s25 = sshll.u32 %s776_s30, 1  ;;  %s139_s10 = scalar_lea.vmem [#allocation4], %s483_s21 }
  0x29   : > { %s1080_s19 = scalar_select %p915_p5, 1, 0 }
  0x2a   : > { %s144_s5 = sadd.s32 %s772_s29, %s484_s25  ;;  %s148_s14 = sshll.u32 %s139_s10, 4  ;;  %s922_s14 = int_to_ptr.vmem [resolvable:$true] %s148_s14 }
  0x2b   : > { %s485_s15 = sshll.u32 %s144_s5, 6  ;;  %p931_p7 = pnand %p512_p4, %p886_p6 }
  0x2c   : > { %s927_s8 = scalar_lea.hbm %s1071_s1, %s485_s15  ;;  %s136_s21 = scalar_lea.sflag [#allocation5], %s135_s20 }
  0x2d   : > { %s626_s25 = scalar_lea.hbm %s927_s8, 64  ;;  %p628_p12 = pneg %p931_p7 }
  0x2e   : > { %p627_p11 = scmp.ne.s32.totalorder %s927_s8, %s626_s25  ;;  %s631_s10 = scalar_lea.hbm %s1071_s1, 256 }
  0x2f   : > { %p632_p6 = scmp.lt.u32.totalorder %s927_s8, %s1071_s1  ;;  %p633_p2 = scmp.lt.u32.totalorder %s631_s10, %s626_s25 }
  0x30   : > { %p629_p13 = pnand %p628_p12, %p627_p11  ;;  %p635_p4 = scmp.lt.u32.totalorder %s626_s25, %s927_s8 }
  0x31   : > { %p634_p3 = por %p633_p2, %p632_p6 }
  0x32   : > { %p630_p0 = pneg %p629_p13 }
  0x33   : > { %p636_p8 = por %p635_p4, %p634_p3 }
  0x35   : > { %p637_p9 = pnand %p636_p8, %p630_p0 }
  0x37   : > { %640 = shalt.err (!%p637_p9)
}
  0x38   : > { %s641_s20 = scalar_lea.vmem %s922_s14, 64  ;;  %s783_s9 = smov [#allocation4]  }
  0x39   : > { %p642_p11 = scmp.ne.s32.totalorder %s922_s14, %s641_s20  ;;  %s646_s11 = sshll.u32 %s783_s9, 4  ;;  %s647_s11 = int_to_ptr.vmem [resolvable:$false] %s646_s11 }
  0x3a   : > { %s648_s5 = scalar_lea.vmem %s647_s11, 128  ;;  %p649_p1 = scmp.lt.s32.totalorder %s922_s14, %s647_s11 }
  0x3b   : > { %p644_p13 = pnand %p642_p11, %p628_p12  ;;  %p650_p6 = scmp.lt.s32.totalorder %s648_s5, %s641_s20 }
  0x3d   : > { %p645_p5 = pneg %p644_p13  ;;  %p651_p2 = por %p650_p6, %p649_p1 }
  0x3f   : > { %p652_p3 = pnand %p651_p2, %p645_p5 }
  0x41   : > { %655 = shalt.err (!%p652_p3)
}
  0x42   : > { %507 = dma.hbm_to_vmem [thread:$0]  (!%p931_p7), %s927_s8, 64, %s922_s14, %s136_s21  }
  0x43   : > { %p1082_p8 = scmp.lt.s32.totalorder %s780_s4, 5  ;;  %p1083_p9 = scmp.ge.s32.totalorder %s780_s4, 1 }
  0x45   : > { %p164_p12 = pnand %p1083_p9, %p1082_p8 }
  0x46   : > { %s169_s25 = sand.u32 (!%p164_p12), 1, %s756_s26  }
  0x47   : > { %167 = sbr.rel (%p164_p12) target bundleno = 370 (0x172), region = 28  ;;  %s487_s10 = sshll.u32 (!%p164_p12), %s169_s25, 2 }
  0x48   : > { %s170_s15 = scalar_lea.sflag (!%p164_p12), [#allocation5], %s169_s25  ;;  %s173_s12 = scalar_lea.vmem (!%p164_p12), [#allocation4], %s487_s10 }
  0x4e   : > { %731 = dma.done.wait (%p894_p10), %s170_s15, 64  }
  0x4f   : > { %733 = vsyncadd (%p894_p10), %s170_s15, 4294967232  ;;  %s198_s8 = sand.u32 1, %s744_s23   ;;  %p200_p1 = scmp.lt.s32.totalorder %s768_s28, 1 }
  0x50   : > { %p202_p5 = scmp.lt.s32.totalorder %s764_s0, 1  ;;  %s984_s5 = scalar_lea.vmem [#allocation7], %s198_s8 }
  0x51   : > { %s201_s14 = scalar_select %p200_p1, %s768_s28, 1 }
  0x52   : > { %s203_s6 = scalar_select %p202_p5, %s764_s0, 1 }
  0x53   : > { %s488_s21 = sshll.u32 %s201_s14, 1  ;;  %p489_p10 = scmp.ne.s32.totalorder %s764_s0, 0 }
  0x54   : > { %s976_s20 = sadd.s32 %s488_s21, %s203_s6  ;;  %vm211_vm0 = vcmask (!%p489_p10), 8192   ;;  %v784_v0 = vmov (!%p489_p10), 0.0  }
  0x55   : > { %s206_s13 = scalar_lea.vmem %s1072_s2, %s976_s20  ;;  %210 = sbr.rel (%p489_p10) target bundleno = 92 (0x5c), region = 36  ;;  %212 = vst.msk [vmem:[%s984_s5] sm:$0x1] (!%p489_p10), %vm211_vm0, %v784_v0 }
  0x5c PF: > { %v213_v1 = vld [vmem:[%s173_s12] sm:$0xf]  ;;  %v785_v8 = vmov 1966171168   ;;  %v247_v10 = vlaneseq  ;;  %s491_s25 = sshll.u32 %s768_s28, 7  ;;  %s490_s6 = sshll.u32 %s764_s0, 7 }
  0x5d   : > { %v216_v2 = vrot.slane %v213_v1, 1  ;;  %v219_v3 = vrot.slane %v213_v1, 2  ;;  %v222_v5 = vrot.slane %v213_v1, 3  ;;  %v245_v9 = vunpack.c.l.s4 %v785_v8  ;;  %v214_v28 = vld [vmem:[%s206_s13] sm:$0x1]  ;;  %s331_s12 = sld [smem:[#allocation3 + %s491_s25]] }
  0x5e   : > { %v248_v19 = vshrl.u32 %v247_v10, 7  ;;  %s335_s14 = sadd.s32 1, %s491_s25  ;;  %vm229_vm1 = vcmp.eq.s32.totalorder %v214_v28, 0  ;;  %vm242_vm2 = vcmp.eq.s32.totalorder %v214_v28, 1  ;;  %v995_v41 = vand.u32 127, %v247_v10  ;;  %s493_s20 = sshll.u32 %s768_s28, 4 }
  0x5f   : > { %v218_v4 = vmax.f32 %v213_v1, %v216_v2  ;;  %v246_v18 = vunpack.c.0.s8 %v245_v9  ;;  %s336_s21 = sld [smem:[#allocation3 + %s335_s14]]  ;;  %v327_v43 = vstv %s490_s6  ;;  %vm271_vm3 = vcmp.eq.s32.totalorder %v214_v28, 2  ;;  %s385_s11 = sshll.u32 %s984_s5, 4  ;;  %s1007_s11 = int_to_ptr.vmem [resolvable:$true] %s385_s11 }
  0x60   : > { %v328_v49 = vadd.s32 %v327_v43, %v995_v41  ;;  %vm300_vm4 = vcmp.eq.s32.totalorder %v214_v28, 3  ;;  %v786_v60 = vmov 0.0   ;;  %vm343_vm10 = vcmask 1040384   ;;  %s1005_s10 = scalar_lea.hbm %s1073_s3, %s493_s20  ;;  %s373_s28 = scalar_lea.sflag [#allocation6], %s198_s8 }
  0x61   : > { %v221_v6 = vmax.f32 %v218_v4, %v219_v3  ;;  %v249_v24 = vsub.s32 %v246_v18, %v248_v19  ;;  %vm365_vm11 = vcmp.eq.s32.totalorder %v995_v41, 0  ;;  %vm370_vm12 = vcmask 8192   ;;  %s656_s15 = scalar_lea.vmem %s1007_s11, 16  ;;  %p1084_p0 = scmp.ne.s32.totalorder %s1079_s16, 0 }
  0x62   : > { %vm329_vm5 = vcmp.lt.s32.totalorder %v328_v49, 256  ;;  %p657_p7 = scmp.ne.s32.totalorder %s1007_s11, %s656_s15 }
  0x63   : > { %v224_v7 = vmax.f32 %v221_v6, %v222_v5  ;;  %v332_v50 = vstv %s331_s12  ;;  %s787_s12 = smov [#allocation7]  }
  0x64   : > { %vm333_vm6 = vcmp.ne.s32.totalorder %v214_v28, %v332_v50  ;;  %p658_p4 = pnand %p657_p7, %p1084_p0  ;;  %s660_s14 = sshll.u32 %s787_s12, 4  ;;  %s661_s14 = int_to_ptr.vmem [resolvable:$false] %s660_s14 }
  0x65   : > { %v225_v11 = vsub.f32 %v213_v1, %v224_v7  ;;  %v233_v12 = vrot.slane %v224_v7, 7  ;;  %v262_v13 = vrot.slane %v224_v7, 6  ;;  %v291_v14 = vrot.slane %v224_v7, 5  ;;  %vm334_vm7 = vmand %vm329_vm5, %vm333_vm6  ;;  %s662_s6 = scalar_lea.vmem %s661_s14, 32  ;;  %p663_p13 = scmp.lt.s32.totalorder %s1007_s11, %s661_s14 }
  0x66   : > { %v337_v54 = vstv %s336_s21  ;;  %p659_p11 = pneg %p658_p4  ;;  %p664_p6 = scmp.lt.s32.totalorder %s662_s6, %s656_s15 }
  0x67   : > { %v226_v15 = vmul.f32 1.442695, %v225_v11  ;;  %v235_v16 = vsub.f32 %v213_v1, %v233_v12  ;;  %v264_v17 = vsub.f32 %v213_v1, %v262_v13  ;;  %v293_v20 = vsub.f32 %v213_v1, %v291_v14 }
  0x68   : > { %v230_v44 = vsel %vm229_vm1, %v225_v11, 0.0  ;;  %vm338_vm8 = vcmp.ne.s32.totalorder %v214_v28, %v337_v54  ;;  %p665_p2 = por %p664_p6, %p663_p13 }
  0x69   : > { %v236_v21 = vmul.f32 1.442695, %v235_v16  ;;  %v265_v22 = vmul.f32 1.442695, %v264_v17  ;;  %606 = vpow2.f32 %v226_v15  ;;  %v294_v23 = vmul.f32 1.442695, %v293_v20  ;;  %vm339_vm9 = vmand %vm334_vm7, %vm338_vm8 }
  0x6a   : > { %v250_v25 = vrot.slane %v235_v16, %v249_v24  ;;  %v279_v26 = vrot.slane %v264_v17, %v249_v24  ;;  %v308_v30 = vrot.slane %v293_v20, %v249_v24  ;;  %v492_v61 = vsel %vm339_vm9, 1.0, %v786_v60  ;;  %v364_v16 = vld [vmem:[%s984_s5] sm:$0x1]  ;;  %p666_p3 = pnand %p665_p2, %p659_p11 }
  0x6b   : > { %608 = vpow2.f32 %v236_v21  ;;  %v354_v1 = vsel %vm343_vm10, %v492_v61, 0.0 }
  0x6c   : > { %610 = vpow2.f32 %v265_v22  ;;  %v251_v29 = vcombine.high %v250_v25, %v250_v25  ;;  %v286_v36 = vrot.slane %v279_v26, %v249_v24  ;;  %v309_v40 = vcombine.high %v308_v30, %v308_v30 }
  0x6d   : > { %612 = vpow2.f32 %v294_v23 }
  0x6e   : > { %v258_v38 = vrot.slane %v251_v29, %v249_v24  ;;  %v287_v46 = vcombine.high %v286_v36, %v286_v36  ;;  %v316_v48 = vrot.slane %v309_v40, %v249_v24 }
  0x70   : > { %v260_v45 = vsel %vm242_vm2, %v258_v38, 0.0  ;;  %v289_v52 = vsel %vm271_vm3, %v287_v46, 0.0  ;;  %v317_v53 = vcombine.high %v316_v48, %v316_v48 }
  0x71   : > { %v261_v51 = vadd.f32 %v260_v45, %v230_v44 }
  0x72   : > { %v319_v56 = vsel %vm300_vm4, %v317_v53, 0.0 }
  0x73   : > { %v607_v27 = vpop.eup %606  ;;  %v290_v55 = vadd.f32 %v289_v52, %v261_v51 }
  0x75   : > { %v609_v31 = vpop.eup %608  ;;  %v320_v57 = vadd.f32 %v319_v56, %v290_v55 }
  0x76   : > { %v611_v32 = vpop.eup %610  ;;  %v239_v33 = vrot.slane %v609_v31, 1 }
  0x77   : > { %v613_v34 = vpop.eup %612  ;;  %v268_v35 = vrot.slane %v611_v32, 2 }
  0x78   : > { %v241_v37 = vadd.f32 %v607_v27, %v239_v33  ;;  %v297_v39 = vrot.slane %v613_v34, 3 }
  0x7a   : > { %v270_v42 = vadd.f32 %v268_v35, %v241_v37 }
  0x7c   : > { %v299_v47 = vadd.f32 %v297_v39, %v270_v42 }
  0x7e   : > { %614 = vlog2.f32 %v299_v47 }
  0x88   : > { %v615_v58 = vpop.eup %614 }
  0x89   : > { %v322_v59 = vmul.f32 0.6931472, %v615_v58 }
  0x8b   : > { %v323_v62 = vsub.f32 %v322_v59, %v320_v57 }
  0x8d   : > { %v342_v63 = vmul.f32 %v492_v61, %v323_v62 }
  0x8f   : > { %v344_v0 = vsel %vm343_vm10, %v342_v63, 0.0 }
  0x90   : > { %345 = vadd.xlane.f32.xlu0 %v344_v0 }
  0x94   : > { %355 = vadd.xlane.f32.xlu0 %v354_v1 }
 0x11d   : > { %v346_v2 = vpop.xlane.xlu0 %345 }
 0x11e   : > { %v347_v3 = vrot.slane %v346_v2, 4 }
 0x120   : > { %v348_v4 = vadd.f32 %v347_v3, %v346_v2 }
 0x121   : > { %v356_v5 = vpop.xlane.xlu0 %355 }
 0x122   : > { %v349_v6 = vrot.slane %v348_v4, 2  ;;  %v357_v7 = vrot.slane %v356_v5, 4 }
 0x124   : > { %v358_v8 = vadd.f32 %v357_v7, %v356_v5  ;;  %v350_v9 = vadd.f32 %v349_v6, %v348_v4 }
 0x126   : > { %v359_v10 = vrot.slane %v358_v8, 2  ;;  %v351_v11 = vrot.slane %v350_v9, 1 }
 0x128   : > { %v360_v12 = vadd.f32 %v359_v10, %v358_v8  ;;  %v352_v13 = vadd.f32 %v351_v11, %v350_v9 }
 0x12a   : > { %496 = vpush %v352_v13  ;;  %v361_v14 = vrot.slane %v360_v12, 1 }
 0x12c   : > { %v362_v15 = vadd.f32 %v361_v14, %v360_v12 }
 0x12e   : > { %498 = vpush %v362_v15 }
 0x15b   : > { %s497_s0 = spop %496 }
 0x15c   : > { %v366_v17 = vstv %s497_s0 }
 0x15f   : > { %s499_s9 = spop %498 }
 0x160   : > { %v367_v18 = vstv %s499_s9 }
 0x161   : > { %v368_v19 = vsel %vm365_vm11, %v366_v17, %v367_v18 }
 0x162   : > { %v369_v20 = vadd.f32 %v368_v19, %v364_v16 }
 0x164   : > { %371 = vst.msk [vmem:[%s984_s5] sm:$0x1] %vm370_vm12, %v369_v20 }
 0x165   : > { %669 = shalt.err (!%p666_p3)
}
 0x166   : > { %s670_s8 = scalar_lea.hbm %s1005_s10, 16  ;;  %s674_s0 = scalar_lea.hbm %s1073_s3, 32 }
 0x167   : > { %p671_p8 = scmp.ne.s32.totalorder %s1005_s10, %s670_s8  ;;  %p675_p1 = scmp.lt.u32.totalorder %s1005_s10, %s1073_s3 }
 0x168   : > { %p676_p5 = scmp.lt.u32.totalorder %s674_s0, %s670_s8  ;;  %p678_p7 = scmp.lt.u32.totalorder %s670_s8, %s1005_s10 }
 0x169   : > { %p672_p9 = pnand %p671_p8, %p1084_p0 }
 0x16a   : > { %p677_p10 = por %p676_p5, %p675_p1 }
 0x16b   : > { %p673_p12 = pneg %p672_p9 }
 0x16c   : > { %p679_p4 = por %p678_p7, %p677_p10 }
 0x16e   : > { %p680_p11 = pnand %p679_p4, %p673_p12 }
 0x170   : > { %683 = shalt.err (!%p680_p11)
}
 0x171   : > { %502 = dma.vmem_to_hbm [thread:$0]  (%p1084_p0), %s1007_s11, 16, %s1005_s10, %s373_s28  }
 0x172 PF: > { %p513_p13 = scmp.ge.s32.totalorder %s780_s4, 2  ;;  %s397_s13 = sand.u32 1, %s740_s22  }
 0x173   : > { %p1085_p6 = scmp.ne.s32.totalorder %s1080_s19, 0  ;;  %s398_s25 = scalar_lea.sflag [#allocation6], %s397_s13 }
 0x175   : > { %p509_p2 = pnand %p513_p13, %p1085_p6 }
 0x177   : > { %735 = dma.done.wait (!%p509_p2), %s398_s25, 16  }
 0x178   : > { %737 = vsyncadd (!%p509_p2), %s398_s25, 4294967280  ;;  %s23_s4 = sadd.s32 1, %s780_s4   ;;  %s1086_s16 = sld [smem:[#allocation11_spill]] }
 0x179   : > { %p20_p3 = scmp.ge.s32.totalorder %s23_s4, 6   ;;  %s1087_s22 = smov %s744_s23 }
 0x17a   : > { %s1088_s23 = smov %s748_s24  ;;  %s1089_s24 = smov %s907_s17 }
 0x17b   : > { %s1090_s25 = smov %s756_s26  ;;  %s1091_s26 = smov %s760_s27 }
 0x17c   : > { %s1092_s27 = smov %s910_s18  ;;  %s1093_s0 = smov %s772_s29 }
 0x17d   : > { %s1094_s28 = smov %s776_s30  ;;  %s1095_s29 = smov %s1098_s7 }
 0x17e   : > { %s1096_s30 = smov %s1086_s16  ;;  %22 = sbr.rel (!%p20_p3) target bundleno = 21 (0x15), region = 80 }
 0x185   :  { %402 = vsyncpa [#allocation5], 1 }
 0x186   :  { %404 = vsyncpa [#allocation5 + $0x1], 1 }
 0x187   :  { %405 = vsyncpa [#allocation6], 1 }
 0x188   :  { %407 = vsyncpa [#allocation6 + $0x1], 1 }

</bundles_post_ra>
